<compile_context>
chip_gen: v5e
topology: v5e:2x2
jax: 0.10.0
libtpu: 0.0.40
codegen_flags: <defaults>
</compile_context>

<pallas_src>
import jax
import jax.numpy as jnp
from jax.experimental import pallas as pl
from jax.experimental.pallas import tpu as pltpu


def _unflatten_dma_kernel(x_hbm, o_hbm, sem):
    # Single HBM -> HBM DMA of the whole flat (B, nhid) buffer.
    # No VMEM staging, no vector load/store slots consumed.
    cp = pltpu.make_async_copy(x_hbm, o_hbm, sem)
    cp.start()
    cp.wait()


def unflatten(x, emsize):
    """x: (B, nhid) -> (B, C, H, W) with emsize = (C, H, W)."""
    B, nhid = x.shape
    C, H, W = emsize
    assert nhid == C * H * W, "nhid must equal prod(emsize)"

    flat = pl.pallas_call(
        _unflatten_dma_kernel,
        out_shape=jax.ShapeDtypeStruct((B, nhid), x.dtype),
        # Keep both operands in place (HBM); the kernel DMAs directly
        # between them instead of letting Pallas bounce through VMEM.
        in_specs=[pl.BlockSpec(memory_space=pl.ANY)],
        out_specs=pl.BlockSpec(memory_space=pl.ANY),
        scratch_shapes=[pltpu.SemaphoreType.DMA],
    )(x)

    # Glue: metadata-only reshape to NCHW, identical to torch.Tensor.view.
    return flat.reshape(B, C, H, W)


if __name__ == "__main__":
    # Module config: emsize = (C, H, W) = (4, 16, 16) -> nhid = 1024.
    emsize = (4, 16, 16)
    nhid = emsize[0] * emsize[1] * emsize[2]
    B = 2

    key = jax.random.PRNGKey(0)
    x = jax.random.normal(key, (B, nhid), dtype=jnp.float32)

    out = jax.block_until_ready(unflatten(x, emsize))

    # Reference: plain reshape (what torch .view does).
    ref = x.reshape(B, *emsize)
    assert out.shape == (B, *emsize), out.shape
    assert out.dtype == x.dtype
    assert jnp.array_equal(out, ref), "mismatch vs reference reshape"

    print("KERNEL_OK")
</pallas_src>

<mosaic_0001>
module attributes {stable_mosaic.version = 11 : i64} {
  func.func @_unflatten_dma_kernel(%arg0: memref<2x1024xf32, #tpu.memory_space<any>>, %arg1: memref<2x1024xf32, #tpu.memory_space<any>>, %arg2: memref<!tpu.dma_semaphore, #tpu.memory_space<semaphore_mem>>) attributes {dimension_semantics = [], scalar_prefetch = 0 : i64, scratch_operands = 1 : i64, tpu.core_type = #tpu.core_type<tc>} {
    tpu.enqueue_dma source(%arg0 : memref<2x1024xf32, #tpu.memory_space<any>>) target(%arg1 : memref<2x1024xf32, #tpu.memory_space<any>>) target_semaphore(%arg2 : memref<!tpu.dma_semaphore, #tpu.memory_space<semaphore_mem>>)
    tpu.wait_dma2 semaphore(%arg2 : memref<!tpu.dma_semaphore, #tpu.memory_space<semaphore_mem>>) src(%arg0 : memref<2x1024xf32, #tpu.memory_space<any>>) dst(%arg1 : memref<2x1024xf32, #tpu.memory_space<any>>)
    return
  }
}

</mosaic_0001>

<bundles_post_ra>
// kernel: tpu_custom_call.1
= control target key start
LH: loop header
LB: loop body
LE: loop exit
PB: predicated region body
PF: predicated region fallthrough
CT: control target
= control target key end

     0   :  { %s33_s12 = smov [#allocation2]   ;;  %s34_s13 = smov [#allocation3]   ;;  %s52_s0 = inlined_call_operand.hbm [shape: f32[2,1024], index: 0, kind: input, shape index: {}]   ;;  %s53_s1 = inlined_call_operand.hbm [shape: f32[2,1024], index: 1, kind: output, shape index: {}]  }
   0x1   :  { %s10_s8 = sshll.u32 %s52_s0, 4  ;;  %s12_s11 = sshll.u32 %s53_s1, 4  ;;  %s11_s8 = int_to_ptr.hbm [resolvable:$true] %s10_s8  ;;  %s13_s11 = int_to_ptr.hbm [resolvable:$true] %s12_s11 }
   0x2   :  { %s35_s14 = smov 0  }
   0x3   :  { %16 = dma.general %s11_s8, 256, %s13_s11, %s33_s12, %s34_s13, [#allocation4], %s35_s14, 0  }
   0x4   :  { %31 = dma.done.wait [#allocation2], 256 }
   0x5   :  { %32 = vsyncadd [#allocation2], 4294967040 }
   0x6   :  { %21 = vsyncmov [#allocation2] }
   0x9   :  { %s22_s15 = vpop.sfrf %21 }
   0xa   :  { %p27_p0 = scmp.ne.s32.totalorder %s22_s15, 0 }
   0xc   :  { %26 = shalt.err (%p27_p0)  }

</bundles_post_ra>
